<compile_context>
chip_gen: v7x
topology: tpu7x:2x2x1
jax: 0.10.0
libtpu: 0.0.40
codegen_flags: <defaults>
</compile_context>

<pallas_src>
import functools

import jax
import jax.numpy as jnp
from jax import lax
from jax.experimental import pallas as pl
from jax.experimental.pallas import tpu as pltpu


def _generator_kernel(x_ref,        # (T*Bp, E) f32 raw embeddings (pre-ReLU), time-major, batch padded
                      wihT_f_ref,   # (E, H)  = wih_f.T
                      wihT_b_ref,   # (E, H)  = wih_b.T
                      whhT_f_ref,   # (H, H)  = whh_f.T
                      whhT_b_ref,   # (H, H)  = whh_b.T
                      b_f_ref,      # (1, H)  = b_ih_f + b_hh_f
                      b_b_ref,      # (1, H)  = b_ih_b + b_hh_b
                      wlinT_f_ref,  # (H, 1)  = w_lin[:, :H].T
                      wlinT_b_ref,  # (H, 1)  = w_lin[:, H:].T
                      blin_ref,     # (1, 1)
                      out_ref,      # (T*Bp, 1)
                      state_f_ref,  # (T*Bp, H) VMEM: pre-activations, then hidden states (fwd)
                      state_b_ref,  # (T*Bp, H) VMEM: pre-activations, then hidden states (bwd)
                      *, seq_len, bpad):
    T, Bp = seq_len, bpad
    H = whhT_f_ref.shape[0]

    # 1) Hoisted input projection: ReLU(x) once, then one well-shaped MXU
    #    matmul per direction with the bias folded in (no per-step broadcast).
    x = jnp.maximum(x_ref[...], 0.0)                                   # (T*Bp, E)
    state_f_ref[...] = (
        jnp.dot(x, wihT_f_ref[...], preferred_element_type=jnp.float32) + b_f_ref[...])
    state_b_ref[...] = (
        jnp.dot(x, wihT_b_ref[...], preferred_element_type=jnp.float32) + b_b_ref[...])

    whhT_f = whhT_f_ref[...]                                           # hoisted loads
    whhT_b = whhT_b_ref[...]

    # 2) Merged, fully-unrolled recurrence. Each step reads the pre-activation
    #    rows for its timestep and overwrites them in place with the hidden
    #    state (read-before-write, so reuse is safe).
    def step(t, carry):
        h_f, h_b = carry
        rf = pl.multiple_of(t * Bp, Bp)
        rb = pl.multiple_of((T - 1 - t) * Bp, Bp)
        h_f = jnp.tanh(state_f_ref[pl.ds(rf, Bp), :]
                       + jnp.dot(h_f, whhT_f, preferred_element_type=jnp.float32))
        h_b = jnp.tanh(state_b_ref[pl.ds(rb, Bp), :]
                       + jnp.dot(h_b, whhT_b, preferred_element_type=jnp.float32))
        state_f_ref[pl.ds(rf, Bp), :] = h_f
        state_b_ref[pl.ds(rb, Bp), :] = h_b
        return (h_f, h_b)

    h0 = jnp.zeros((Bp, H), jnp.float32)
    lax.fori_loop(0, T, step, (h0, h0), unroll=True)

    # 3) Epilogue: ReLU, per-direction linear (no concatenate / no (T,B,2H)
    #    temporary), bias, ReLU. Output is tiny (T*Bp floats), so the
    #    lane-sparse (·,1) store is negligible.
    hf = jnp.maximum(state_f_ref[...], 0.0)                            # (T*Bp, H)
    hb = jnp.maximum(state_b_ref[...], 0.0)
    logits = (jnp.dot(hf, wlinT_f_ref[...], preferred_element_type=jnp.float32)
              + jnp.dot(hb, wlinT_b_ref[...], preferred_element_type=jnp.float32)
              + blin_ref[...])                                         # (T*Bp, 1)
    out_ref[...] = jnp.maximum(logits, 0.0)


@jax.jit
def generator_forward(inputs, params):
    """inputs: (B, T) int32 token ids -> (B, T, 1) f32 logits (post-ReLU)."""
    f32 = jnp.float32
    emb = jnp.take(params['embeddings'].astype(f32), inputs, axis=0)   # (B, T, E) gather glue
    B, T, E = emb.shape
    H = params['whh_f'].shape[0]
    Bp = ((B + 7) // 8) * 8                                            # pad batch to sublane multiple

    # Time-major, batch padded to Bp, flattened to rows (8-aligned per step).
    x = jnp.transpose(emb, (1, 0, 2))                                  # (T, B, E)
    x = jnp.pad(x, ((0, 0), (0, Bp - B), (0, 0)))                      # (T, Bp, E)
    x2d = x.reshape(T * Bp, E)

    # Pre-transposed / pre-combined weights (kernel never transposes).
    wihT_f = params['wih_f'].astype(f32).T                             # (E, H)
    wihT_b = params['wih_b'].astype(f32).T
    whhT_f = params['whh_f'].astype(f32).T                             # (H, H)
    whhT_b = params['whh_b'].astype(f32).T
    b_f = (params['b_ih_f'] + params['b_hh_f']).astype(f32).reshape(1, H)
    b_b = (params['b_ih_b'] + params['b_hh_b']).astype(f32).reshape(1, H)
    wlinT_f = params['w_lin'][:, :H].astype(f32).T                     # (H, 1)
    wlinT_b = params['w_lin'][:, H:].astype(f32).T                     # (H, 1)
    blin = params['b_lin'].astype(f32).reshape(1, 1)

    vmem = pl.BlockSpec(memory_space=pltpu.VMEM)
    out = pl.pallas_call(
        functools.partial(_generator_kernel, seq_len=T, bpad=Bp),
        out_shape=jax.ShapeDtypeStruct((T * Bp, 1), jnp.float32),
        in_specs=[vmem] * 10,
        out_specs=vmem,
        scratch_shapes=[
            pltpu.VMEM((T * Bp, H), jnp.float32),
            pltpu.VMEM((T * Bp, H), jnp.float32),
        ],
    )(x2d, wihT_f, wihT_b, whhT_f, whhT_b, b_f, b_b, wlinT_f, wlinT_b, blin)

    out = out.reshape(T, Bp, 1)[:, :B, :]                              # drop batch padding
    return jnp.transpose(out, (1, 0, 2))                               # (B, T, 1) batch_first


def _reference_forward(inputs, params):
    """Pure-JAX reference matching torch semantics, for validation."""
    emb = jnp.take(params['embeddings'], inputs, axis=0)
    x = jnp.maximum(emb, 0.0)                                          # (B, T, E)
    B, T, _ = x.shape
    H = params['whh_f'].shape[0]

    def run_dir(wih, whh, b_ih, b_hh, reverse):
        def step(h, x_t):
            h_new = jnp.tanh(x_t @ wih.T + b_ih + h @ whh.T + b_hh)
            return h_new, h_new
        xs = jnp.transpose(x, (1, 0, 2))                               # (T, B, E)
        _, hs = lax.scan(step, jnp.zeros((B, H), jnp.float32), xs, reverse=reverse)
        return jnp.transpose(hs, (1, 0, 2))                            # (B, T, H)

    hf = run_dir(params['wih_f'], params['whh_f'], params['b_ih_f'], params['b_hh_f'], False)
    hb = run_dir(params['wih_b'], params['whh_b'], params['b_ih_b'], params['b_hh_b'], True)
    out = jnp.maximum(jnp.concatenate([hf, hb], axis=-1), 0.0)
    lin = out @ params['w_lin'].T + params['b_lin']
    return jnp.maximum(lin, 0.0)


def make_params(key, vocab, embed_dim, hidden_dim):
    ks = jax.random.split(key, 10)
    s = 1.0 / jnp.sqrt(hidden_dim)
    u = lambda k, shape: jax.random.uniform(k, shape, jnp.float32, -s, s)
    return {
        'embeddings': jax.random.normal(ks[0], (vocab, embed_dim), jnp.float32),
        'wih_f': u(ks[1], (hidden_dim, embed_dim)),
        'whh_f': u(ks[2], (hidden_dim, hidden_dim)),
        'b_ih_f': u(ks[3], (hidden_dim,)),
        'b_hh_f': u(ks[4], (hidden_dim,)),
        'wih_b': u(ks[5], (hidden_dim, embed_dim)),
        'whh_b': u(ks[6], (hidden_dim, hidden_dim)),
        'b_ih_b': u(ks[7], (hidden_dim,)),
        'b_hh_b': u(ks[8], (hidden_dim,)),
        'w_lin': u(ks[9], (1, 2 * hidden_dim)),
        'b_lin': jnp.zeros((1,), jnp.float32),
    }


if __name__ == "__main__":
    B, T, E, H, V = 2, 8, 16, 32, 50
    key = jax.random.PRNGKey(0)
    k_params, k_inputs = jax.random.split(key)
    params = make_params(k_params, V, E, H)
    inputs = jax.random.randint(k_inputs, (B, T), 0, V, dtype=jnp.int32)

    out = generator_forward(inputs, params)
    out = jax.block_until_ready(out)

    ref = _reference_forward(inputs, params)
    assert out.shape == (B, T, 1), out.shape
    assert jnp.allclose(out, ref, atol=1e-5, rtol=1e-5), float(jnp.max(jnp.abs(out - ref)))

    print("KERNEL_OK")
</pallas_src>

<mosaic_0001>
module attributes {stable_mosaic.version = 11 : i64} {
  func.func @_generator_kernel(%arg0: memref<64x16xf32, #tpu.memory_space<vmem>>, %arg1: memref<16x32xf32, #tpu.memory_space<vmem>>, %arg2: memref<16x32xf32, #tpu.memory_space<vmem>>, %arg3: memref<32x32xf32, #tpu.memory_space<vmem>>, %arg4: memref<32x32xf32, #tpu.memory_space<vmem>>, %arg5: memref<1x32xf32, #tpu.memory_space<vmem>>, %arg6: memref<1x32xf32, #tpu.memory_space<vmem>>, %arg7: memref<32x1xf32, #tpu.memory_space<vmem>>, %arg8: memref<32x1xf32, #tpu.memory_space<vmem>>, %arg9: memref<1x1xf32, #tpu.memory_space<vmem>>, %arg10: memref<64x1xf32, #tpu.memory_space<vmem>>, %arg11: memref<64x32xf32, #tpu.memory_space<vmem>>, %arg12: memref<64x32xf32, #tpu.memory_space<vmem>>) attributes {dimension_semantics = [], scalar_prefetch = 0 : i64, scratch_operands = 2 : i64, tpu.core_type = #tpu.core_type<tc>} {
    %c0 = arith.constant 0 : index
    %c0_0 = arith.constant 0 : index
    %0 = vector.load %arg0[%c0, %c0_0] : memref<64x16xf32, #tpu.memory_space<vmem>>, vector<64x16xf32>
    %cst = arith.constant 0.000000e+00 : f32
    %1 = vector.broadcast %cst : f32 to vector<64x16xf32>
    %2 = arith.maximumf %0, %1 : vector<64x16xf32>
    %c0_1 = arith.constant 0 : index
    %c0_2 = arith.constant 0 : index
    %3 = vector.load %arg1[%c0_1, %c0_2] : memref<16x32xf32, #tpu.memory_space<vmem>>, vector<16x32xf32>
    %cst_3 = arith.constant dense<0.000000e+00> : vector<64x32xf32>
    %4 = tpu.matmul %2, %3, %cst_3 {dimension_numbers = #tpu.dot_dimension_numbers<[1], [0], [0], [1], [0, 0, 1, 1], [], []>} : vector<64x16xf32>, vector<16x32xf32>, vector<64x32xf32> -> vector<64x32xf32>
    %c0_4 = arith.constant 0 : index
    %c0_5 = arith.constant 0 : index
    %5 = vector.load %arg5[%c0_4, %c0_5] : memref<1x32xf32, #tpu.memory_space<vmem>>, vector<1x32xf32>
    %6 = vector.broadcast %5 : vector<1x32xf32> to vector<64x32xf32>
    %7 = arith.addf %4, %6 : vector<64x32xf32>
    %c0_6 = arith.constant 0 : index
    %c0_7 = arith.constant 0 : index
    %8 = vector.load %arg11[%c0_6, %c0_7] : memref<64x32xf32, #tpu.memory_space<vmem>>, vector<64x32xf32>
    tpu.vector_store %arg11[%c0_6, %c0_7], %7 {strides = array<i32>} : memref<64x32xf32, #tpu.memory_space<vmem>>, vector<64x32xf32>,
    %c0_8 = arith.constant 0 : index
    %c0_9 = arith.constant 0 : index
    %9 = vector.load %arg2[%c0_8, %c0_9] : memref<16x32xf32, #tpu.memory_space<vmem>>, vector<16x32xf32>
    %cst_10 = arith.constant dense<0.000000e+00> : vector<64x32xf32>
    %10 = tpu.matmul %2, %9, %cst_10 {dimension_numbers = #tpu.dot_dimension_numbers<[1], [0], [0], [1], [0, 0, 1, 1], [], []>} : vector<64x16xf32>, vector<16x32xf32>, vector<64x32xf32> -> vector<64x32xf32>
    %c0_11 = arith.constant 0 : index
    %c0_12 = arith.constant 0 : index
    %11 = vector.load %arg6[%c0_11, %c0_12] : memref<1x32xf32, #tpu.memory_space<vmem>>, vector<1x32xf32>
    %12 = vector.broadcast %11 : vector<1x32xf32> to vector<64x32xf32>
    %13 = arith.addf %10, %12 : vector<64x32xf32>
    %c0_13 = arith.constant 0 : index
    %c0_14 = arith.constant 0 : index
    %14 = vector.load %arg12[%c0_13, %c0_14] : memref<64x32xf32, #tpu.memory_space<vmem>>, vector<64x32xf32>
    tpu.vector_store %arg12[%c0_13, %c0_14], %13 {strides = array<i32>} : memref<64x32xf32, #tpu.memory_space<vmem>>, vector<64x32xf32>,
    %c0_15 = arith.constant 0 : index
    %c0_16 = arith.constant 0 : index
    %15 = vector.load %arg3[%c0_15, %c0_16] : memref<32x32xf32, #tpu.memory_space<vmem>>, vector<32x32xf32>
    %c0_17 = arith.constant 0 : index
    %c0_18 = arith.constant 0 : index
    %16 = vector.load %arg4[%c0_17, %c0_18] : memref<32x32xf32, #tpu.memory_space<vmem>>, vector<32x32xf32>
    %cst_19 = arith.constant 0.000000e+00 : f32
    %17 = vector.broadcast %cst_19 : f32 to vector<8x32xf32>
    %c0_i32 = arith.constant 0 : i32
    %c8_i32 = arith.constant 8 : i32
    %18 = arith.muli %c0_i32, %c8_i32 : i32
    %19 = tpu.assume_multiple %18, 8 : i32
    %c7_i32 = arith.constant 7 : i32
    %20 = arith.subi %c7_i32, %c0_i32 : i32
    %c8_i32_20 = arith.constant 8 : i32
    %21 = arith.muli %20, %c8_i32_20 : i32
    %22 = tpu.assume_multiple %21, 8 : i32
    %23 = arith.index_cast %19 : i32 to index
    %c0_21 = arith.constant 0 : index
    %24 = vector.load %arg11[%23, %c0_21] : memref<64x32xf32, #tpu.memory_space<vmem>>, vector<8x32xf32>
    %cst_22 = arith.constant dense<0.000000e+00> : vector<8x32xf32>
    %25 = tpu.matmul %17, %15, %cst_22 {dimension_numbers = #tpu.dot_dimension_numbers<[1], [0], [0], [1], [0, 0, 1, 1], [], []>} : vector<8x32xf32>, vector<32x32xf32>, vector<8x32xf32> -> vector<8x32xf32>
    %26 = arith.addf %24, %25 : vector<8x32xf32>
    %27 = math.tanh %26 : vector<8x32xf32>
    %28 = arith.index_cast %22 : i32 to index
    %c0_23 = arith.constant 0 : index
    %29 = vector.load %arg12[%28, %c0_23] : memref<64x32xf32, #tpu.memory_space<vmem>>, vector<8x32xf32>
    %cst_24 = arith.constant dense<0.000000e+00> : vector<8x32xf32>
    %30 = tpu.matmul %17, %16, %cst_24 {dimension_numbers = #tpu.dot_dimension_numbers<[1], [0], [0], [1], [0, 0, 1, 1], [], []>} : vector<8x32xf32>, vector<32x32xf32>, vector<8x32xf32> -> vector<8x32xf32>
    %31 = arith.addf %29, %30 : vector<8x32xf32>
    %32 = math.tanh %31 : vector<8x32xf32>
    %33 = arith.index_cast %19 : i32 to index
    %c0_25 = arith.constant 0 : index
    %34 = vector.load %arg11[%33, %c0_25] : memref<64x32xf32, #tpu.memory_space<vmem>>, vector<8x32xf32>
    tpu.vector_store %arg11[%33, %c0_25], %27 {strides = array<i32>} : memref<64x32xf32, #tpu.memory_space<vmem>>, vector<8x32xf32>,
    %35 = arith.index_cast %22 : i32 to index
    %c0_26 = arith.constant 0 : index
    %36 = vector.load %arg12[%35, %c0_26] : memref<64x32xf32, #tpu.memory_space<vmem>>, vector<8x32xf32>
    tpu.vector_store %arg12[%35, %c0_26], %32 {strides = array<i32>} : memref<64x32xf32, #tpu.memory_space<vmem>>, vector<8x32xf32>,
    %c1_i32 = arith.constant 1 : i32
    %c8_i32_27 = arith.constant 8 : i32
    %37 = arith.muli %c1_i32, %c8_i32_27 : i32
    %38 = tpu.assume_multiple %37, 8 : i32
    %c7_i32_28 = arith.constant 7 : i32
    %39 = arith.subi %c7_i32_28, %c1_i32 : i32
    %c8_i32_29 = arith.constant 8 : i32
    %40 = arith.muli %39, %c8_i32_29 : i32
    %41 = tpu.assume_multiple %40, 8 : i32
    %42 = arith.index_cast %38 : i32 to index
    %c0_30 = arith.constant 0 : index
    %43 = vector.load %arg11[%42, %c0_30] : memref<64x32xf32, #tpu.memory_space<vmem>>, vector<8x32xf32>
    %cst_31 = arith.constant dense<0.000000e+00> : vector<8x32xf32>
    %44 = tpu.matmul %27, %15, %cst_31 {dimension_numbers = #tpu.dot_dimension_numbers<[1], [0], [0], [1], [0, 0, 1, 1], [], []>} : vector<8x32xf32>, vector<32x32xf32>, vector<8x32xf32> -> vector<8x32xf32>
    %45 = arith.addf %43, %44 : vector<8x32xf32>
    %46 = math.tanh %45 : vector<8x32xf32>
    %47 = arith.index_cast %41 : i32 to index
    %c0_32 = arith.constant 0 : index
    %48 = vector.load %arg12[%47, %c0_32] : memref<64x32xf32, #tpu.memory_space<vmem>>, vector<8x32xf32>
    %cst_33 = arith.constant dense<0.000000e+00> : vector<8x32xf32>
    %49 = tpu.matmul %32, %16, %cst_33 {dimension_numbers = #tpu.dot_dimension_numbers<[1], [0], [0], [1], [0, 0, 1, 1], [], []>} : vector<8x32xf32>, vector<32x32xf32>, vector<8x32xf32> -> vector<8x32xf32>
    %50 = arith.addf %48, %49 : vector<8x32xf32>
    %51 = math.tanh %50 : vector<8x32xf32>
    %52 = arith.index_cast %38 : i32 to index
    %c0_34 = arith.constant 0 : index
    %53 = vector.load %arg11[%52, %c0_34] : memref<64x32xf32, #tpu.memory_space<vmem>>, vector<8x32xf32>
    tpu.vector_store %arg11[%52, %c0_34], %46 {strides = array<i32>} : memref<64x32xf32, #tpu.memory_space<vmem>>, vector<8x32xf32>,
    %54 = arith.index_cast %41 : i32 to index
    %c0_35 = arith.constant 0 : index
    %55 = vector.load %arg12[%54, %c0_35] : memref<64x32xf32, #tpu.memory_space<vmem>>, vector<8x32xf32>
    tpu.vector_store %arg12[%54, %c0_35], %51 {strides = array<i32>} : memref<64x32xf32, #tpu.memory_space<vmem>>, vector<8x32xf32>,
    %c2_i32 = arith.constant 2 : i32
    %c8_i32_36 = arith.constant 8 : i32
    %56 = arith.muli %c2_i32, %c8_i32_36 : i32
    %57 = tpu.assume_multiple %56, 8 : i32
    %c7_i32_37 = arith.constant 7 : i32
    %58 = arith.subi %c7_i32_37, %c2_i32 : i32
    %c8_i32_38 = arith.constant 8 : i32
    %59 = arith.muli %58, %c8_i32_38 : i32
    %60 = tpu.assume_multiple %59, 8 : i32
    %61 = arith.index_cast %57 : i32 to index
    %c0_39 = arith.constant 0 : index
    %62 = vector.load %arg11[%61, %c0_39] : memref<64x32xf32, #tpu.memory_space<vmem>>, vector<8x32xf32>
    %cst_40 = arith.constant dense<0.000000e+00> : vector<8x32xf32>
    %63 = tpu.matmul %46, %15, %cst_40 {dimension_numbers = #tpu.dot_dimension_numbers<[1], [0], [0], [1], [0, 0, 1, 1], [], []>} : vector<8x32xf32>, vector<32x32xf32>, vector<8x32xf32> -> vector<8x32xf32>
    %64 = arith.addf %62, %63 : vector<8x32xf32>
    %65 = math.tanh %64 : vector<8x32xf32>
    %66 = arith.index_cast %60 : i32 to index
    %c0_41 = arith.constant 0 : index
    %67 = vector.load %arg12[%66, %c0_41] : memref<64x32xf32, #tpu.memory_space<vmem>>, vector<8x32xf32>
    %cst_42 = arith.constant dense<0.000000e+00> : vector<8x32xf32>
    %68 = tpu.matmul %51, %16, %cst_42 {dimension_numbers = #tpu.dot_dimension_numbers<[1], [0], [0], [1], [0, 0, 1, 1], [], []>} : vector<8x32xf32>, vector<32x32xf32>, vector<8x32xf32> -> vector<8x32xf32>
    %69 = arith.addf %67, %68 : vector<8x32xf32>
    %70 = math.tanh %69 : vector<8x32xf32>
    %71 = arith.index_cast %57 : i32 to index
    %c0_43 = arith.constant 0 : index
    %72 = vector.load %arg11[%71, %c0_43] : memref<64x32xf32, #tpu.memory_space<vmem>>, vector<8x32xf32>
    tpu.vector_store %arg11[%71, %c0_43], %65 {strides = array<i32>} : memref<64x32xf32, #tpu.memory_space<vmem>>, vector<8x32xf32>,
    %73 = arith.index_cast %60 : i32 to index
    %c0_44 = arith.constant 0 : index
    %74 = vector.load %arg12[%73, %c0_44] : memref<64x32xf32, #tpu.memory_space<vmem>>, vector<8x32xf32>
    tpu.vector_store %arg12[%73, %c0_44], %70 {strides = array<i32>} : memref<64x32xf32, #tpu.memory_space<vmem>>, vector<8x32xf32>,
    %c3_i32 = arith.constant 3 : i32
    %c8_i32_45 = arith.constant 8 : i32
    %75 = arith.muli %c3_i32, %c8_i32_45 : i32
    %76 = tpu.assume_multiple %75, 8 : i32
    %c7_i32_46 = arith.constant 7 : i32
    %77 = arith.subi %c7_i32_46, %c3_i32 : i32
    %c8_i32_47 = arith.constant 8 : i32
    %78 = arith.muli %77, %c8_i32_47 : i32
    %79 = tpu.assume_multiple %78, 8 : i32
    %80 = arith.index_cast %76 : i32 to index
    %c0_48 = arith.constant 0 : index
    %81 = vector.load %arg11[%80, %c0_48] : memref<64x32xf32, #tpu.memory_space<vmem>>, vector<8x32xf32>
    %cst_49 = arith.constant dense<0.000000e+00> : vector<8x32xf32>
    %82 = tpu.matmul %65, %15, %cst_49 {dimension_numbers = #tpu.dot_dimension_numbers<[1], [0], [0], [1], [0, 0, 1, 1], [], []>} : vector<8x32xf32>, vector<32x32xf32>, vector<8x32xf32> -> vector<8x32xf32>
    %83 = arith.addf %81, %82 : vector<8x32xf32>
    %84 = math.tanh %83 : vector<8x32xf32>
    %85 = arith.index_cast %79 : i32 to index
    %c0_50 = arith.constant 0 : index
    %86 = vector.load %arg12[%85, %c0_50] : memref<64x32xf32, #tpu.memory_space<vmem>>, vector<8x32xf32>
    %cst_51 = arith.constant dense<0.000000e+00> : vector<8x32xf32>
    %87 = tpu.matmul %70, %16, %cst_51 {dimension_numbers = #tpu.dot_dimension_numbers<[1], [0], [0], [1], [0, 0, 1, 1], [], []>} : vector<8x32xf32>, vector<32x32xf32>, vector<8x32xf32> -> vector<8x32xf32>
    %88 = arith.addf %86, %87 : vector<8x32xf32>
    %89 = math.tanh %88 : vector<8x32xf32>
    %90 = arith.index_cast %76 : i32 to index
    %c0_52 = arith.constant 0 : index
    %91 = vector.load %arg11[%90, %c0_52] : memref<64x32xf32, #tpu.memory_space<vmem>>, vector<8x32xf32>
    tpu.vector_store %arg11[%90, %c0_52], %84 {strides = array<i32>} : memref<64x32xf32, #tpu.memory_space<vmem>>, vector<8x32xf32>,
    %92 = arith.index_cast %79 : i32 to index
    %c0_53 = arith.constant 0 : index
    %93 = vector.load %arg12[%92, %c0_53] : memref<64x32xf32, #tpu.memory_space<vmem>>, vector<8x32xf32>
    tpu.vector_store %arg12[%92, %c0_53], %89 {strides = array<i32>} : memref<64x32xf32, #tpu.memory_space<vmem>>, vector<8x32xf32>,
    %c4_i32 = arith.constant 4 : i32
    %c8_i32_54 = arith.constant 8 : i32
    %94 = arith.muli %c4_i32, %c8_i32_54 : i32
    %95 = tpu.assume_multiple %94, 8 : i32
    %c7_i32_55 = arith.constant 7 : i32
    %96 = arith.subi %c7_i32_55, %c4_i32 : i32
    %c8_i32_56 = arith.constant 8 : i32
    %97 = arith.muli %96, %c8_i32_56 : i32
    %98 = tpu.assume_multiple %97, 8 : i32
    %99 = arith.index_cast %95 : i32 to index
    %c0_57 = arith.constant 0 : index
    %100 = vector.load %arg11[%99, %c0_57] : memref<64x32xf32, #tpu.memory_space<vmem>>, vector<8x32xf32>
    %cst_58 = arith.constant dense<0.000000e+00> : vector<8x32xf32>
    %101 = tpu.matmul %84, %15, %cst_58 {dimension_numbers = #tpu.dot_dimension_numbers<[1], [0], [0], [1], [0, 0, 1, 1], [], []>} : vector<8x32xf32>, vector<32x32xf32>, vector<8x32xf32> -> vector<8x32xf32>
    %102 = arith.addf %100, %101 : vector<8x32xf32>
    %103 = math.tanh %102 : vector<8x32xf32>
    %104 = arith.index_cast %98 : i32 to index
    %c0_59 = arith.constant 0 : index
    %105 = vector.load %arg12[%104, %c0_59] : memref<64x32xf32, #tpu.memory_space<vmem>>, vector<8x32xf32>
    %cst_60 = arith.constant dense<0.000000e+00> : vector<8x32xf32>
    %106 = tpu.matmul %89, %16, %cst_60 {dimension_numbers = #tpu.dot_dimension_numbers<[1], [0], [0], [1], [0, 0, 1, 1], [], []>} : vector<8x32xf32>, vector<32x32xf32>, vector<8x32xf32> -> vector<8x32xf32>
    %107 = arith.addf %105, %106 : vector<8x32xf32>
    %108 = math.tanh %107 : vector<8x32xf32>
    %109 = arith.index_cast %95 : i32 to index
    %c0_61 = arith.constant 0 : index
    %110 = vector.load %arg11[%109, %c0_61] : memref<64x32xf32, #tpu.memory_space<vmem>>, vector<8x32xf32>
    tpu.vector_store %arg11[%109, %c0_61], %103 {strides = array<i32>} : memref<64x32xf32, #tpu.memory_space<vmem>>, vector<8x32xf32>,
    %111 = arith.index_cast %98 : i32 to index
    %c0_62 = arith.constant 0 : index
    %112 = vector.load %arg12[%111, %c0_62] : memref<64x32xf32, #tpu.memory_space<vmem>>, vector<8x32xf32>
    tpu.vector_store %arg12[%111, %c0_62], %108 {strides = array<i32>} : memref<64x32xf32, #tpu.memory_space<vmem>>, vector<8x32xf32>,
    %c5_i32 = arith.constant 5 : i32
    %c8_i32_63 = arith.constant 8 : i32
    %113 = arith.muli %c5_i32, %c8_i32_63 : i32
    %114 = tpu.assume_multiple %113, 8 : i32
    %c7_i32_64 = arith.constant 7 : i32
    %115 = arith.subi %c7_i32_64, %c5_i32 : i32
    %c8_i32_65 = arith.constant 8 : i32
    %116 = arith.muli %115, %c8_i32_65 : i32
    %117 = tpu.assume_multiple %116, 8 : i32
    %118 = arith.index_cast %114 : i32 to index
    %c0_66 = arith.constant 0 : index
    %119 = vector.load %arg11[%118, %c0_66] : memref<64x32xf32, #tpu.memory_space<vmem>>, vector<8x32xf32>
    %cst_67 = arith.constant dense<0.000000e+00> : vector<8x32xf32>
    %120 = tpu.matmul %103, %15, %cst_67 {dimension_numbers = #tpu.dot_dimension_numbers<[1], [0], [0], [1], [0, 0, 1, 1], [], []>} : vector<8x32xf32>, vector<32x32xf32>, vector<8x32xf32> -> vector<8x32xf32>
    %121 = arith.addf %119, %120 : vector<8x32xf32>
    %122 = math.tanh %121 : vector<8x32xf32>
    %123 = arith.index_cast %117 : i32 to index
    %c0_68 = arith.constant 0 : index
    %124 = vector.load %arg12[%123, %c0_68] : memref<64x32xf32, #tpu.memory_space<vmem>>, vector<8x32xf32>
    %cst_69 = arith.constant dense<0.000000e+00> : vector<8x32xf32>
    %125 = tpu.matmul %108, %16, %cst_69 {dimension_numbers = #tpu.dot_dimension_numbers<[1], [0], [0], [1], [0, 0, 1, 1], [], []>} : vector<8x32xf32>, vector<32x32xf32>, vector<8x32xf32> -> vector<8x32xf32>
    %126 = arith.addf %124, %125 : vector<8x32xf32>
    %127 = math.tanh %126 : vector<8x32xf32>
    %128 = arith.index_cast %114 : i32 to index
    %c0_70 = arith.constant 0 : index
    %129 = vector.load %arg11[%128, %c0_70] : memref<64x32xf32, #tpu.memory_space<vmem>>, vector<8x32xf32>
    tpu.vector_store %arg11[%128, %c0_70], %122 {strides = array<i32>} : memref<64x32xf32, #tpu.memory_space<vmem>>, vector<8x32xf32>,
    %130 = arith.index_cast %117 : i32 to index
    %c0_71 = arith.constant 0 : index
    %131 = vector.load %arg12[%130, %c0_71] : memref<64x32xf32, #tpu.memory_space<vmem>>, vector<8x32xf32>
    tpu.vector_store %arg12[%130, %c0_71], %127 {strides = array<i32>} : memref<64x32xf32, #tpu.memory_space<vmem>>, vector<8x32xf32>,
    %c6_i32 = arith.constant 6 : i32
    %c8_i32_72 = arith.constant 8 : i32
    %132 = arith.muli %c6_i32, %c8_i32_72 : i32
    %133 = tpu.assume_multiple %132, 8 : i32
    %c7_i32_73 = arith.constant 7 : i32
    %134 = arith.subi %c7_i32_73, %c6_i32 : i32
    %c8_i32_74 = arith.constant 8 : i32
    %135 = arith.muli %134, %c8_i32_74 : i32
    %136 = tpu.assume_multiple %135, 8 : i32
    %137 = arith.index_cast %133 : i32 to index
    %c0_75 = arith.constant 0 : index
    %138 = vector.load %arg11[%137, %c0_75] : memref<64x32xf32, #tpu.memory_space<vmem>>, vector<8x32xf32>
    %cst_76 = arith.constant dense<0.000000e+00> : vector<8x32xf32>
    %139 = tpu.matmul %122, %15, %cst_76 {dimension_numbers = #tpu.dot_dimension_numbers<[1], [0], [0], [1], [0, 0, 1, 1], [], []>} : vector<8x32xf32>, vector<32x32xf32>, vector<8x32xf32> -> vector<8x32xf32>
    %140 = arith.addf %138, %139 : vector<8x32xf32>
    %141 = math.tanh %140 : vector<8x32xf32>
    %142 = arith.index_cast %136 : i32 to index
    %c0_77 = arith.constant 0 : index
    %143 = vector.load %arg12[%142, %c0_77] : memref<64x32xf32, #tpu.memory_space<vmem>>, vector<8x32xf32>
    %cst_78 = arith.constant dense<0.000000e+00> : vector<8x32xf32>
    %144 = tpu.matmul %127, %16, %cst_78 {dimension_numbers = #tpu.dot_dimension_numbers<[1], [0], [0], [1], [0, 0, 1, 1], [], []>} : vector<8x32xf32>, vector<32x32xf32>, vector<8x32xf32> -> vector<8x32xf32>
    %145 = arith.addf %143, %144 : vector<8x32xf32>
    %146 = math.tanh %145 : vector<8x32xf32>
    %147 = arith.index_cast %133 : i32 to index
    %c0_79 = arith.constant 0 : index
    %148 = vector.load %arg11[%147, %c0_79] : memref<64x32xf32, #tpu.memory_space<vmem>>, vector<8x32xf32>
    tpu.vector_store %arg11[%147, %c0_79], %141 {strides = array<i32>} : memref<64x32xf32, #tpu.memory_space<vmem>>, vector<8x32xf32>,
    %149 = arith.index_cast %136 : i32 to index
    %c0_80 = arith.constant 0 : index
    %150 = vector.load %arg12[%149, %c0_80] : memref<64x32xf32, #tpu.memory_space<vmem>>, vector<8x32xf32>
    tpu.vector_store %arg12[%149, %c0_80], %146 {strides = array<i32>} : memref<64x32xf32, #tpu.memory_space<vmem>>, vector<8x32xf32>,
    %c7_i32_81 = arith.constant 7 : i32
    %c8_i32_82 = arith.constant 8 : i32
    %151 = arith.muli %c7_i32_81, %c8_i32_82 : i32
    %152 = tpu.assume_multiple %151, 8 : i32
    %c7_i32_83 = arith.constant 7 : i32
    %153 = arith.subi %c7_i32_83, %c7_i32_81 : i32
    %c8_i32_84 = arith.constant 8 : i32
    %154 = arith.muli %153, %c8_i32_84 : i32
    %155 = tpu.assume_multiple %154, 8 : i32
    %156 = arith.index_cast %152 : i32 to index
    %c0_85 = arith.constant 0 : index
    %157 = vector.load %arg11[%156, %c0_85] : memref<64x32xf32, #tpu.memory_space<vmem>>, vector<8x32xf32>
    %cst_86 = arith.constant dense<0.000000e+00> : vector<8x32xf32>
    %158 = tpu.matmul %141, %15, %cst_86 {dimension_numbers = #tpu.dot_dimension_numbers<[1], [0], [0], [1], [0, 0, 1, 1], [], []>} : vector<8x32xf32>, vector<32x32xf32>, vector<8x32xf32> -> vector<8x32xf32>
    %159 = arith.addf %157, %158 : vector<8x32xf32>
    %160 = math.tanh %159 : vector<8x32xf32>
    %161 = arith.index_cast %155 : i32 to index
    %c0_87 = arith.constant 0 : index
    %162 = vector.load %arg12[%161, %c0_87] : memref<64x32xf32, #tpu.memory_space<vmem>>, vector<8x32xf32>
    %cst_88 = arith.constant dense<0.000000e+00> : vector<8x32xf32>
    %163 = tpu.matmul %146, %16, %cst_88 {dimension_numbers = #tpu.dot_dimension_numbers<[1], [0], [0], [1], [0, 0, 1, 1], [], []>} : vector<8x32xf32>, vector<32x32xf32>, vector<8x32xf32> -> vector<8x32xf32>
    %164 = arith.addf %162, %163 : vector<8x32xf32>
    %165 = math.tanh %164 : vector<8x32xf32>
    %166 = arith.index_cast %152 : i32 to index
    %c0_89 = arith.constant 0 : index
    %167 = vector.load %arg11[%166, %c0_89] : memref<64x32xf32, #tpu.memory_space<vmem>>, vector<8x32xf32>
    tpu.vector_store %arg11[%166, %c0_89], %160 {strides = array<i32>} : memref<64x32xf32, #tpu.memory_space<vmem>>, vector<8x32xf32>,
    %168 = arith.index_cast %155 : i32 to index
    %c0_90 = arith.constant 0 : index
    %169 = vector.load %arg12[%168, %c0_90] : memref<64x32xf32, #tpu.memory_space<vmem>>, vector<8x32xf32>
    tpu.vector_store %arg12[%168, %c0_90], %165 {strides = array<i32>} : memref<64x32xf32, #tpu.memory_space<vmem>>, vector<8x32xf32>,
    %c8_i32_91 = arith.constant 8 : i32
    %c0_92 = arith.constant 0 : index
    %c0_93 = arith.constant 0 : index
    %170 = vector.load %arg11[%c0_92, %c0_93] : memref<64x32xf32, #tpu.memory_space<vmem>>, vector<64x32xf32>
    %cst_94 = arith.constant 0.000000e+00 : f32
    %171 = vector.broadcast %cst_94 : f32 to vector<64x32xf32>
    %172 = arith.maximumf %170, %171 : vector<64x32xf32>
    %c0_95 = arith.constant 0 : index
    %c0_96 = arith.constant 0 : index
    %173 = vector.load %arg12[%c0_95, %c0_96] : memref<64x32xf32, #tpu.memory_space<vmem>>, vector<64x32xf32>
    %cst_97 = arith.constant 0.000000e+00 : f32
    %174 = vector.broadcast %cst_97 : f32 to vector<64x32xf32>
    %175 = arith.maximumf %173, %174 : vector<64x32xf32>
    %c0_98 = arith.constant 0 : index
    %c0_99 = arith.constant 0 : index
    %176 = vector.load %arg7[%c0_98, %c0_99] : memref<32x1xf32, #tpu.memory_space<vmem>>, vector<32x1xf32>
    %cst_100 = arith.constant dense<0.000000e+00> : vector<64x1xf32>
    %177 = tpu.matmul %172, %176, %cst_100 {dimension_numbers = #tpu.dot_dimension_numbers<[1], [0], [0], [1], [0, 0, 1, 1], [], []>} : vector<64x32xf32>, vector<32x1xf32>, vector<64x1xf32> -> vector<64x1xf32>
    %c0_101 = arith.constant 0 : index
    %c0_102 = arith.constant 0 : index
    %178 = vector.load %arg8[%c0_101, %c0_102] : memref<32x1xf32, #tpu.memory_space<vmem>>, vector<32x1xf32>
    %cst_103 = arith.constant dense<0.000000e+00> : vector<64x1xf32>
    %179 = tpu.matmul %175, %178, %cst_103 {dimension_numbers = #tpu.dot_dimension_numbers<[1], [0], [0], [1], [0, 0, 1, 1], [], []>} : vector<64x32xf32>, vector<32x1xf32>, vector<64x1xf32> -> vector<64x1xf32>
    %180 = arith.addf %177, %179 : vector<64x1xf32>
    %c0_104 = arith.constant 0 : index
    %c0_105 = arith.constant 0 : index
    %181 = vector.load %arg9[%c0_104, %c0_105] : memref<1x1xf32, #tpu.memory_space<vmem>>, vector<1x1xf32>
    %182 = vector.broadcast %181 : vector<1x1xf32> to vector<64x1xf32>
    %183 = arith.addf %180, %182 : vector<64x1xf32>
    %cst_106 = arith.constant 0.000000e+00 : f32
    %184 = vector.broadcast %cst_106 : f32 to vector<64x1xf32>
    %185 = arith.maximumf %183, %184 : vector<64x1xf32>
    %c0_107 = arith.constant 0 : index
    %c0_108 = arith.constant 0 : index
    %186 = vector.load %arg10[%c0_107, %c0_108] : memref<64x1xf32, #tpu.memory_space<vmem>>, vector<64x1xf32>
    tpu.vector_store %arg10[%c0_107, %c0_108], %185 {strides = array<i32>} : memref<64x1xf32, #tpu.memory_space<vmem>>, vector<64x1xf32>,
    return
  }
}

</mosaic_0001>

<bundles_post_ra>
// kernel: generator_forward.1
= control target key start
LH: loop header
LB: loop body
LE: loop exit
PB: predicated region body
PF: predicated region fallthrough
CT: control target
= control target key end

     0   :  { %vm62_vm0 = vcmask 130048   ;;  %v2492_v19 = vmov 0.0|0.0   ;;  %vm2493_vm1 = vmmov 0   ;;  %v2494_v35 = vmov 0.0   ;;  %s2859_s1 = inlined_call_operand.vmem [shape: f32[16,32], index: 1, kind: input, shape index: {}]   ;;  %s2860_s2 = inlined_call_operand.vmem [shape: f32[16,32], index: 2, kind: input, shape index: {}]   ;;  %s2861_s0 = inlined_call_operand.vmem [shape: f32[64,16], index: 0, kind: input, shape index: {}]   ;;  %s2862_s4 = inlined_call_operand.vmem [shape: f32[32,32], index: 4, kind: input, shape index: {}]   ;;  %s2863_s3 = inlined_call_operand.vmem [shape: f32[32,32], index: 3, kind: input, shape index: {}]   ;;  %s2864_s6 = inlined_call_operand.vmem [shape: f32[1,32], index: 6, kind: input, shape index: {}]   ;;  %s2865_s5 = inlined_call_operand.vmem [shape: f32[1,32], index: 5, kind: input, shape index: {}]   ;;  %s2866_s7 = inlined_call_operand.vmem [shape: f32[32,1], index: 7, kind: input, shape index: {}]   ;;  %s2867_s8 = inlined_call_operand.vmem [shape: f32[32,1], index: 8, kind: input, shape index: {}]   ;;  %s2868_s9 = inlined_call_operand.<no memory space> [shape: f32[1,1], index: 9, kind: input, shape index: {}]   ;;  %s2869_s10 = inlined_call_operand.vmem [shape: f32[64,1], index: 10, kind: output, shape index: {}]  }
   0x1   :  { %v53_v0 = vld [vmem:[%s2859_s1] sm:$0xff]  ;;  %v54_v1 = vld [vmem:[%s2859_s1 + $0x8] sm:$0xff]  ;;  %v39_v9 = vld [vmem:[%s2861_s0 + $0x10] sm:$0xff]  ;;  %vm192_vm2 = vcmask 261120   ;;  %vm1895_vm3 = vcmask 7168  }
   0x2   :  { %v201_v2 = vld [vmem:[%s2860_s2] sm:$0xff]  ;;  %v2329_v3 = vpack.c.bf16 %v54_v1, %v53_v0  ;;  %v202_v4 = vld [vmem:[%s2860_s2 + $0x8] sm:$0xff]  ;;  %v47_v13 = vmax.f32 %v39_v9, 0.0  ;;  %v40_v14 = vld [vmem:[%s2861_s0 + $0x18] sm:$0xff] }
   0x3   :  { %v37_v5 = vld [vmem:[%s2861_s0] sm:$0xff]  ;;  %v38_v6 = vld [vmem:[%s2861_s0 + $0x8] sm:$0xff]  ;;  %v2333_v7 = vpack.c.bf16 %v202_v4, %v201_v2  ;;  %v329_v21 = vld [vmem:[%s2862_s4 + $0x10] sm:$0xff]  ;;  %v48_v23 = vmax.f32 %v40_v14, 0.0 }
   0x4   :  { %v45_v8 = vmax.f32 %v37_v5, 0.0  ;;  %v327_v10 = vld [vmem:[%s2862_s4] sm:$0xff]  ;;  %2330 = vmatprep.subr.bf16.mxu0 %v2329_v3  ;;  %v46_v11 = vmax.f32 %v38_v6, 0.0  ;;  %v328_v12 = vld [vmem:[%s2862_s4 + $0x8] sm:$0xff]  ;;  %v330_v22 = vld [vmem:[%s2862_s4 + $0x18] sm:$0xff] }
   0x5   :  { %2334 = vmatprep.subr.bf16.mxu1 %v2333_v7  ;;  %2332 = vmatpush3.bf16.msra.mxu0 %v2329_v3  ;;  %v323_v15 = vld [vmem:[%s2863_s3] sm:$0xff]  ;;  %v324_v16 = vld [vmem:[%s2863_s3 + $0x8] sm:$0xff]  ;;  %v2587_v17 = vpack.c.bf16 %v328_v12, %v327_v10  ;;  %v325_v24 = vld [vmem:[%s2863_s3 + $0x10] sm:$0xff]  ;;  %v2620_v29 = vpack.c.bf16 %v330_v22, %v329_v21 }
   0x6   :  { %2336 = vmatpush3.bf16.msra.mxu1 %v2333_v7  ;;  %2085 = vmatprep.mubr.msk.f32.mxu0 %vm62_vm0, %v45_v8  ;;  %v41_v18 = vld [vmem:[%s2861_s0 + $0x20] sm:$0xff]  ;;  %v2594_v20 = vpack.c.bf16 %v324_v16, %v323_v15  ;;  %v326_v25 = vld [vmem:[%s2863_s3 + $0x18] sm:$0xff]  ;;  %v42_v27 = vld [vmem:[%s2861_s0 + $0x28] sm:$0xff] }
   0x7   :  { %2101 = vmatprep.mubr.msk.f32.mxu1 %vm62_vm0, %v45_v8  ;;  %2343 = vmatprep.subr.bf16.mxu1 %v2492_v19  ;;  %v49_v26 = vmax.f32 %v41_v18, 0.0  ;;  %v43_v28 = vld [vmem:[%s2861_s0 + $0x30] sm:$0xff]  ;;  %v2623_v30 = vpack.c.bf16 %v326_v25, %v325_v24  ;;  %v50_v31 = vmax.f32 %v42_v27, 0.0  ;;  %v44_v33 = vld [vmem:[%s2861_s0 + $0x38] sm:$0xff]  ;;  %v1917_v36 = vld [vmem:[%s2864_s6] ss:$0 sm:$0xff] }
   0x8   :  { %2086 = vmatmul.mubr.msk.f32.vlgmr.msra.gmra.mrb[0].mxu0 %vm62_vm0, %v46_v11  ;;  %2337 = vmatprep.subr.bf16.mxu0 %v2492_v19  ;;  %v51_v32 = vmax.f32 %v43_v28, 0.0  ;;  %v52_v34 = vmax.f32 %v44_v33, 0.0  ;;  %v1908_v37 = vld [vmem:[%s2865_s5] ss:$0 sm:$0xff] }
   0x9   :  { %2102 = vmatmul.mubr.msk.f32.vlgmr.msra.gmra.mrb[0].mxu1 %vm62_vm0, %v46_v11  ;;  %2088 = vmatprep.mubr.msk.f32.mxu0 %vm62_vm0, %v47_v13 }
   0xa   :  { %2104 = vmatprep.mubr.msk.f32.mxu1 %vm62_vm0, %v47_v13  ;;  %2345 = vmatpush3.bf16.msra.mxu1 %v2587_v17 }
   0xb   :  { %2339 = vmatpush3.bf16.msra.mxu0 %v2594_v20  ;;  %2346 = vmatprep.subr.bf16.mxu1 %v2492_v19 }
   0xc   :  { %2089 = vmatmul.mubr.msk.f32.gmra.mrb[2].mxu0 %vm62_vm0, %v48_v23  ;;  %2340 = vmatprep.subr.bf16.mxu0 %v2492_v19 }
   0xd   :  { %2105 = vmatmul.mubr.msk.f32.gmra.mrb[2].mxu1 %vm62_vm0, %v48_v23  ;;  %2091 = vmatprep.mubr.msk.f32.mxu0 %vm62_vm0, %v49_v26 }
   0xe   :  { %2107 = vmatprep.mubr.msk.f32.mxu1 %vm62_vm0, %v49_v26  ;;  %2348 = vmatpush3.bf16.msra.mxu1 %v2620_v29 }
   0xf   :  { %2342 = vmatpush3.bf16.msra.mxu0 %v2623_v30  ;;  %2355 = vmatprep.subr.bf16.mxu1 %v2492_v19 }
  0x10   :  { %2092 = vmatmul.mubr.msk.f32.gmra.mrb[4].mxu0 %vm62_vm0, %v50_v31  ;;  %2349 = vmatprep.subr.bf16.mxu0 %v2492_v19 }
  0x11   :  { %2108 = vmatmul.mubr.msk.f32.gmra.mrb[4].mxu1 %vm62_vm0, %v50_v31  ;;  %2094 = vmatprep.mubr.msk.f32.mxu0 %vm62_vm0, %v51_v32 }
  0x12   :  { %2110 = vmatprep.mubr.msk.f32.mxu1 %vm62_vm0, %v51_v32 }
  0x14   :  { %2095 = vmatmul.mubr.msk.f32.gmra.mrb[6].mxu0 %vm62_vm0, %v52_v34 }
  0x15   :  { %2111 = vmatmul.mubr.msk.f32.gmra.mrb[6].mxu1 %vm62_vm0, %v52_v34  ;;  %2121 = vmatprep.mubr.msk.f32.mxu0 %vm2493_vm1, %v2494_v35 }
  0x16   :  { %2132 = vmatprep.mubr.msk.f32.mxu1 %vm2493_vm1, %v2494_v35 }
  0x18   :  { %2122 = vmatmul.mubr.f32.vlgmr.msra.gmra.mrb[8].mxu0 %v2494_v35 }
  0x19   :  { %2133 = vmatmul.mubr.f32.vlgmr.msra.gmra.mrb[8].mxu1 %v2494_v35  ;;  %2351 = vmatpush3.bf16.msra.mxu0 %v2594_v20 }
  0x1a   :  { %2352 = vmatprep.subr.bf16.mxu0 %v2492_v19  ;;  %2143 = vmatprep.mubr.msk.f32.mxu0 %vm2493_vm1, %v2494_v35 }
  0x1b   :  { %2357 = vmatpush3.bf16.msra.mxu1 %v2587_v17  ;;  %2154 = vmatprep.mubr.msk.f32.mxu1 %vm2493_vm1, %v2494_v35 }
  0x1c   :  { %2358 = vmatprep.subr.bf16.mxu1 %v2492_v19 }
  0x1d   :  { %2354 = vmatpush3.bf16.msra.mxu0 %v2623_v30 }
  0x1e   :  { %2361 = vmatprep.subr.bf16.mxu0 %v2492_v19 }
  0x1f   :  { %2360 = vmatpush3.bf16.msra.mxu1 %v2620_v29 }
  0x20   :  { %2367 = vmatprep.subr.bf16.mxu1 %v2492_v19 }
  0xdb   :  { %v2087_v38 = vpop.f32.mrb[0].mxu0 }
  0xdc   :  { %v2103_v39 = vpop.f32.mrb[0].mxu1  ;;  %v159_v40 = vadd.f32 %v2087_v38, %v1908_v37  ;;  %v153_v41 = vpop.f32.mrb[1].mxu0 }
  0xdd   :  { %v282_v42 = vadd.f32 %v2103_v39, %v1917_v36  ;;  %v276_v43 = vpop.f32.mrb[1].mxu1  ;;  %v154_v44 = vadd.f32 %v1908_v37, %v153_v41 }
  0xde   :  { %v277_v45 = vadd.f32 %v1917_v36, %v276_v43  ;;  %194 = vst.msk [vmem:[#allocation2 + $0x8] sm:$0xff] %vm192_vm2, %v159_v40 }
  0xdf   :  { %316 = vst.msk [vmem:[#allocation3 + $0x8] sm:$0xff] %vm192_vm2, %v282_v42  ;;  %193 = vst.msk [vmem:[#allocation2] sm:$0xff] %vm192_vm2, %v154_v44  ;;  %v2090_v46 = vpop.f32.mrb[2].mxu0 }
  0xe0   :  { %315 = vst.msk [vmem:[#allocation3] sm:$0xff] %vm192_vm2, %v277_v45  ;;  %v2106_v47 = vpop.f32.mrb[2].mxu1  ;;  %v169_v48 = vadd.f32 %v2090_v46, %v1908_v37  ;;  %v163_v49 = vpop.f32.mrb[3].mxu0 }
  0xe1   :  { %v292_v50 = vadd.f32 %v2106_v47, %v1917_v36  ;;  %v286_v51 = vpop.f32.mrb[3].mxu1  ;;  %v164_v52 = vadd.f32 %v1908_v37, %v163_v49 }
  0xe2   :  { %v287_v53 = vadd.f32 %v1917_v36, %v286_v51  ;;  %196 = vst.msk [vmem:[#allocation2 + $0x18] sm:$0xff] %vm192_vm2, %v169_v48 }
  0xe3   :  { %318 = vst.msk [vmem:[#allocation3 + $0x18] sm:$0xff] %vm192_vm2, %v292_v50  ;;  %195 = vst.msk [vmem:[#allocation2 + $0x10] sm:$0xff] %vm192_vm2, %v164_v52  ;;  %v2093_v54 = vpop.f32.mrb[4].mxu0 }
  0xe4   :  { %317 = vst.msk [vmem:[#allocation3 + $0x10] sm:$0xff] %vm192_vm2, %v287_v53  ;;  %v2109_v55 = vpop.f32.mrb[4].mxu1  ;;  %v179_v56 = vadd.f32 %v2093_v54, %v1908_v37  ;;  %v173_v57 = vpop.f32.mrb[5].mxu0 }
  0xe5   :  { %v302_v58 = vadd.f32 %v2109_v55, %v1917_v36  ;;  %v296_v59 = vpop.f32.mrb[5].mxu1  ;;  %v174_v60 = vadd.f32 %v1908_v37, %v173_v57  ;;  %v484_v16 = vld [vmem:[#allocation2 + $0x8] sm:$0xff] }
  0xe6   :  { %v297_v61 = vadd.f32 %v1917_v36, %v296_v59  ;;  %198 = vst.msk [vmem:[#allocation2 + $0x28] sm:$0xff] %vm192_vm2, %v179_v56  ;;  %v331_v5 = vld [vmem:[#allocation2] sm:$0xff] }
  0xe7   :  { %320 = vst.msk [vmem:[#allocation3 + $0x28] sm:$0xff] %vm192_vm2, %v302_v58  ;;  %197 = vst.msk [vmem:[#allocation2 + $0x20] sm:$0xff] %vm192_vm2, %v174_v60  ;;  %v2096_v62 = vpop.f32.mrb[6].mxu0 }
  0xe8   :  { %319 = vst.msk [vmem:[#allocation3 + $0x20] sm:$0xff] %vm192_vm2, %v297_v61  ;;  %v2112_v63 = vpop.f32.mrb[6].mxu1  ;;  %v189_v0 = vadd.f32 %v2096_v62, %v1908_v37  ;;  %v183_v1 = vpop.f32.mrb[7].mxu0 }
  0xe9   :  { %v312_v2 = vadd.f32 %v2112_v63, %v1917_v36  ;;  %v306_v3 = vpop.f32.mrb[7].mxu1  ;;  %v184_v4 = vadd.f32 %v1908_v37, %v183_v1  ;;  %v796_v42 = vld [vmem:[#allocation2 + $0x18] sm:$0xff] }
  0xea   :  { %v307_v6 = vadd.f32 %v1917_v36, %v306_v3  ;;  %200 = vst.msk [vmem:[#allocation2 + $0x38] sm:$0xff] %vm192_vm2, %v189_v0  ;;  %v640_v31 = vld [vmem:[#allocation2 + $0x10] sm:$0xff]  ;;  %v1029_v56 = vld [vmem:[#allocation3 + $0x18] sm:$0xff] }
  0xeb   :  { %322 = vst.msk [vmem:[#allocation3 + $0x38] sm:$0xff] %vm192_vm2, %v312_v2  ;;  %199 = vst.msk [vmem:[#allocation2 + $0x30] sm:$0xff] %vm192_vm2, %v184_v4  ;;  %v401_v7 = vpop.f32.mrb[8].mxu0  ;;  %v1185_v2 = vld [vmem:[#allocation3 + $0x10] sm:$0xff] }
  0xec   :  { %321 = vst.msk [vmem:[#allocation3 + $0x30] sm:$0xff] %vm192_vm2, %v307_v6  ;;  %v405_v8 = vadd.f32 %v401_v7, %v331_v5  ;;  %v475_v9 = vpop.f32.mrb[8].mxu1  ;;  %v2123_v10 = vpop.f32.mrb[9].mxu0 }
  0xed   :  { %v2134_v11 = vpop.f32.mrb[9].mxu1  ;;  %v1108_v62 = vld [vmem:[#allocation2 + $0x28] sm:$0xff] }
  0xee   :  { %2460 = vtanh.f32 %v405_v8  ;;  %v717_v36 = vld [vmem:[#allocation3 + $0x28] sm:$0xff]  ;;  %v952_v52 = vld [vmem:[#allocation2 + $0x20] sm:$0xff] }
  0xef   :  { %v873_v46 = vld [vmem:[#allocation3 + $0x20] sm:$0xff] }
  0xf2   :  { %v408_v12 = vld [vmem:[#allocation3 + $0x38] sm:$0xff] }
  0xf3   :  { %v479_v13 = vadd.f32 %v475_v9, %v408_v12  ;;  %v561_v23 = vld [vmem:[#allocation3 + $0x30] sm:$0xff] }
  0xf4   :  { %v1264_v9 = vld [vmem:[#allocation2 + $0x30] sm:$0xff] }
  0xf5   :  { %2462 = vtanh.f32 %v479_v13 }
  0xf8   :  { %v2461_v14 = vpop.eup %2460 }
  0xf9   :  { %481 = vst.msk [vmem:[#allocation2] sm:$0xff] %vm192_vm2, %v2461_v14  ;;  %2144 = vmatmul.mubr.msk.f32.vlgmr.msra.gmra.mrb[10].mxu0 %vm192_vm2, %v2461_v14  ;;  %v1609_v14 = vld [vmem:[%s2866_s7 + $0x18] sm:$0xff] }
  0xfa   :  { %2363 = vmatpush3.bf16.msra.mxu0 %v2594_v20  ;;  %2165 = vmatprep.mubr.msk.f32.mxu0 %vm2493_vm1, %v2494_v35 }
  0xfb   :  { %2364 = vmatprep.subr.bf16.mxu0 %v2492_v19 }
  0xfe   :  { %2366 = vmatpush3.bf16.msra.mxu0 %v2623_v30 }
  0xff   :  { %v2463_v15 = vpop.eup %2462  ;;  %2373 = vmatprep.subr.bf16.mxu0 %v2492_v19 }
 0x100   :  { %482 = vst.msk [vmem:[#allocation3 + $0x38] sm:$0xff] %vm192_vm2, %v2463_v15  ;;  %2155 = vmatmul.mubr.msk.f32.vlgmr.msra.gmra.mrb[10].mxu1 %vm192_vm2, %v2463_v15  ;;  %v1574_v15 = vld [vmem:[#allocation2] sm:$0xff] }
 0x101   :  { %2369 = vmatpush3.bf16.msra.mxu1 %v2587_v17  ;;  %2176 = vmatprep.mubr.msk.f32.mxu1 %vm2493_vm1, %v2494_v35 }
 0x102   :  { %2370 = vmatprep.subr.bf16.mxu1 %v2492_v19 }
 0x105   :  { %2372 = vmatpush3.bf16.msra.mxu1 %v2620_v29 }
 0x106   :  { %2379 = vmatprep.subr.bf16.mxu1 %v2492_v19 }
 0x1cc   :  { %v554_v18 = vpop.f32.mrb[10].mxu0 }
 0x1cd   :  { %v558_v21 = vadd.f32 %v554_v18, %v484_v16  ;;  %v2145_v22 = vpop.f32.mrb[11].mxu0 }
 0x1cf   :  { %2464 = vtanh.f32 %v558_v21  ;;  %v1582_v21 = vmax.f32 %v1574_v15, 0.0 }
 0x1d3   :  { %v631_v24 = vpop.f32.mrb[10].mxu1 }
 0x1d4   :  { %v635_v25 = vadd.f32 %v631_v24, %v561_v23  ;;  %v2156_v26 = vpop.f32.mrb[11].mxu1 }
 0x1d6   :  { %2466 = vtanh.f32 %v635_v25 }
 0x1d9   :  { %v2465_v27 = vpop.eup %2464 }
 0x1da   :  { %637 = vst.msk [vmem:[#allocation2 + $0x8] sm:$0xff] %vm192_vm2, %v2465_v27  ;;  %2166 = vmatmul.mubr.msk.f32.vlgmr.msra.gmra.mrb[12].mxu0 %vm192_vm2, %v2465_v27 }
 0x1db   :  { %2375 = vmatpush3.bf16.msra.mxu0 %v2594_v20  ;;  %2187 = vmatprep.mubr.msk.f32.mxu0 %vm2493_vm1, %v2494_v35 }
 0x1dc   :  { %2376 = vmatprep.subr.bf16.mxu0 %v2492_v19 }
 0x1df   :  { %2378 = vmatpush3.bf16.msra.mxu0 %v2623_v30 }
 0x1e0   :  { %v2467_v28 = vpop.eup %2466  ;;  %2385 = vmatprep.subr.bf16.mxu0 %v2492_v19 }
 0x1e1   :  { %638 = vst.msk [vmem:[#allocation3 + $0x30] sm:$0xff] %vm192_vm2, %v2467_v28  ;;  %2177 = vmatmul.mubr.msk.f32.vlgmr.msra.gmra.mrb[12].mxu1 %vm192_vm2, %v2467_v28  ;;  %v1575_v22 = vld [vmem:[#allocation2 + $0x8] sm:$0xff] }
 0x1e2   :  { %2381 = vmatpush3.bf16.msra.mxu1 %v2587_v17  ;;  %2198 = vmatprep.mubr.msk.f32.mxu1 %vm2493_vm1, %v2494_v35  ;;  %v1583_v25 = vmax.f32 %v1575_v22, 0.0 }
 0x1e3   :  { %2382 = vmatprep.subr.bf16.mxu1 %v2492_v19 }
 0x1e6   :  { %2384 = vmatpush3.bf16.msra.mxu1 %v2620_v29 }
 0x1e7   :  { %2391 = vmatprep.subr.bf16.mxu1 %v2492_v19 }
 0x2ad   :  { %v710_v32 = vpop.f32.mrb[12].mxu0 }
 0x2ae   :  { %v714_v33 = vadd.f32 %v710_v32, %v640_v31  ;;  %v2167_v34 = vpop.f32.mrb[13].mxu0 }
 0x2b0   :  { %2468 = vtanh.f32 %v714_v33 }
 0x2b4   :  { %v787_v37 = vpop.f32.mrb[12].mxu1 }
 0x2b5   :  { %v791_v38 = vadd.f32 %v787_v37, %v717_v36  ;;  %v2178_v39 = vpop.f32.mrb[13].mxu1 }
 0x2b6   :  { %v1611_v39 = vld [vmem:[%s2867_s8 + $0x8] sm:$0xff] }
 0x2b7   :  { %2470 = vtanh.f32 %v791_v38  ;;  %v1610_v38 = vld [vmem:[%s2867_s8] sm:$0xff] }
 0x2ba   :  { %v2469_v40 = vpop.eup %2468 }
 0x2bb   :  { %793 = vst.msk [vmem:[#allocation2 + $0x10] sm:$0xff] %vm192_vm2, %v2469_v40  ;;  %2188 = vmatmul.mubr.msk.f32.vlgmr.msra.gmra.mrb[14].mxu0 %vm192_vm2, %v2469_v40  ;;  %v2433_v40 = vpack.c.bf16 %v1611_v39, %v1610_v38 }
 0x2bc   :  { %2387 = vmatpush3.bf16.msra.mxu0 %v2594_v20  ;;  %2209 = vmatprep.mubr.msk.f32.mxu0 %vm2493_vm1, %v2494_v35 }
 0x2bd   :  { %2388 = vmatprep.subr.bf16.mxu0 %v2492_v19 }
 0x2c0   :  { %2390 = vmatpush3.bf16.msra.mxu0 %v2623_v30 }
 0x2c1   :  { %v2471_v41 = vpop.eup %2470  ;;  %2397 = vmatprep.subr.bf16.mxu0 %v2492_v19 }
 0x2c2   :  { %794 = vst.msk [vmem:[#allocation3 + $0x28] sm:$0xff] %vm192_vm2, %v2471_v41  ;;  %2199 = vmatmul.mubr.msk.f32.vlgmr.msra.gmra.mrb[14].mxu1 %vm192_vm2, %v2471_v41  ;;  %v1576_v23 = vld [vmem:[#allocation2 + $0x10] sm:$0xff] }
 0x2c3   :  { %2393 = vmatpush3.bf16.msra.mxu1 %v2587_v17  ;;  %2220 = vmatprep.mubr.msk.f32.mxu1 %vm2493_vm1, %v2494_v35  ;;  %v1584_v26 = vmax.f32 %v1576_v23, 0.0  ;;  %v1612_v41 = vld [vmem:[%s2867_s8 + $0x10] sm:$0xff] }
 0x2c4   :  { %2394 = vmatprep.subr.bf16.mxu1 %v2492_v19 }
 0x2c7   :  { %2396 = vmatpush3.bf16.msra.mxu1 %v2620_v29 }
 0x2c8   :  { %2403 = vmatprep.subr.bf16.mxu1 %v2492_v19 }
 0x38e   :  { %v866_v43 = vpop.f32.mrb[14].mxu0 }
 0x38f   :  { %v870_v44 = vadd.f32 %v866_v43, %v796_v42  ;;  %v2189_v45 = vpop.f32.mrb[15].mxu0  ;;  %v1613_v42 = vld [vmem:[%s2867_s8 + $0x18] sm:$0xff] }
 0x390   :  { %v2437_v43 = vpack.c.bf16 %v1613_v42, %v1612_v41 }
 0x391   :  { %2472 = vtanh.f32 %v870_v44  ;;  %v1420_v44 = vld [vmem:[#allocation2 + $0x38] sm:$0xff] }
 0x395   :  { %v943_v47 = vpop.f32.mrb[14].mxu1 }
 0x396   :  { %v947_v48 = vadd.f32 %v943_v47, %v873_v46  ;;  %v2200_v49 = vpop.f32.mrb[15].mxu1 }
 0x398   :  { %2474 = vtanh.f32 %v947_v48  ;;  %v1496_v48 = vld [vmem:[#allocation3] sm:$0xff] }
 0x39b   :  { %v2473_v50 = vpop.eup %2472 }
 0x39c   :  { %949 = vst.msk [vmem:[#allocation2 + $0x18] sm:$0xff] %vm192_vm2, %v2473_v50  ;;  %2210 = vmatmul.mubr.msk.f32.vlgmr.msra.gmra.mrb[16].mxu0 %vm192_vm2, %v2473_v50 }
 0x39d   :  { %2399 = vmatpush3.bf16.msra.mxu0 %v2594_v20  ;;  %2231 = vmatprep.mubr.msk.f32.mxu0 %vm2493_vm1, %v2494_v35 }
 0x39e   :  { %2400 = vmatprep.subr.bf16.mxu0 %v2492_v19 }
 0x3a1   :  { %2402 = vmatpush3.bf16.msra.mxu0 %v2623_v30 }
 0x3a2   :  { %v2475_v51 = vpop.eup %2474  ;;  %2409 = vmatprep.subr.bf16.mxu0 %v2492_v19 }
 0x3a3   :  { %950 = vst.msk [vmem:[#allocation3 + $0x20] sm:$0xff] %vm192_vm2, %v2475_v51  ;;  %2221 = vmatmul.mubr.msk.f32.vlgmr.msra.gmra.mrb[16].mxu1 %vm192_vm2, %v2475_v51  ;;  %v1577_v27 = vld [vmem:[#allocation2 + $0x18] sm:$0xff] }
 0x3a4   :  { %2405 = vmatpush3.bf16.msra.mxu1 %v2587_v17  ;;  %2242 = vmatprep.mubr.msk.f32.mxu1 %vm2493_vm1, %v2494_v35  ;;  %v1585_v31 = vmax.f32 %v1577_v27, 0.0 }
 0x3a5   :  { %2406 = vmatprep.subr.bf16.mxu1 %v2492_v19 }
 0x3a8   :  { %2408 = vmatpush3.bf16.msra.mxu1 %v2620_v29 }
 0x3a9   :  { %2415 = vmatprep.subr.bf16.mxu1 %v2492_v19 }
 0x46f   :  { %v1022_v53 = vpop.f32.mrb[16].mxu0 }
 0x470   :  { %v1026_v54 = vadd.f32 %v1022_v53, %v952_v52  ;;  %v2211_v55 = vpop.f32.mrb[17].mxu0 }
 0x472   :  { %2476 = vtanh.f32 %v1026_v54 }
 0x476   :  { %v1099_v57 = vpop.f32.mrb[16].mxu1 }
 0x477   :  { %v1103_v58 = vadd.f32 %v1099_v57, %v1029_v56  ;;  %v2222_v59 = vpop.f32.mrb[17].mxu1 }
 0x479   :  { %2478 = vtanh.f32 %v1103_v58 }
 0x47c   :  { %v2477_v60 = vpop.eup %2476 }
 0x47d   :  { %1105 = vst.msk [vmem:[#allocation2 + $0x20] sm:$0xff] %vm192_vm2, %v2477_v60  ;;  %2232 = vmatmul.mubr.msk.f32.vlgmr.msra.gmra.mrb[18].mxu0 %vm192_vm2, %v2477_v60 }
 0x47e   :  { %2411 = vmatpush3.bf16.msra.mxu0 %v2594_v20  ;;  %2253 = vmatprep.mubr.msk.f32.mxu0 %vm2493_vm1, %v2494_v35 }
 0x47f   :  { %2412 = vmatprep.subr.bf16.mxu0 %v2492_v19 }
 0x482   :  { %2414 = vmatpush3.bf16.msra.mxu0 %v2623_v30 }
 0x483   :  { %v2479_v61 = vpop.eup %2478  ;;  %2421 = vmatprep.subr.bf16.mxu0 %v2492_v19 }
 0x484   :  { %1106 = vst.msk [vmem:[#allocation3 + $0x18] sm:$0xff] %vm192_vm2, %v2479_v61  ;;  %2243 = vmatmul.mubr.msk.f32.vlgmr.msra.gmra.mrb[18].mxu1 %vm192_vm2, %v2479_v61  ;;  %v1578_v28 = vld [vmem:[#allocation2 + $0x20] sm:$0xff] }
 0x485   :  { %2417 = vmatpush3.bf16.msra.mxu1 %v2587_v17  ;;  %2264 = vmatprep.mubr.msk.f32.mxu1 %vm2493_vm1, %v2494_v35  ;;  %v1586_v32 = vmax.f32 %v1578_v28, 0.0 }
 0x486   :  { %2418 = vmatprep.subr.bf16.mxu1 %v2492_v19 }
 0x489   :  { %2420 = vmatpush3.bf16.msra.mxu1 %v2620_v29 }
 0x48a   :  { %2427 = vmatprep.subr.bf16.mxu1 %v2492_v19 }
 0x550   :  { %v1178_v63 = vpop.f32.mrb[18].mxu0 }
 0x551   :  { %v1182_v0 = vadd.f32 %v1178_v63, %v1108_v62  ;;  %v2233_v1 = vpop.f32.mrb[19].mxu0 }
 0x553   :  { %2480 = vtanh.f32 %v1182_v0 }
 0x557   :  { %v1255_v3 = vpop.f32.mrb[18].mxu1 }
 0x558   :  { %v1259_v4 = vadd.f32 %v1255_v3, %v1185_v2  ;;  %v2244_v5 = vpop.f32.mrb[19].mxu1 }
 0x559   :  { %v1594_v5 = vld [vmem:[#allocation3 + $0x20] sm:$0xff] }
 0x55a   :  { %2482 = vtanh.f32 %v1259_v4  ;;  %v1593_v4 = vld [vmem:[#allocation3 + $0x18] sm:$0xff] }
 0x55d   :  { %v2481_v6 = vpop.eup %2480 }
 0x55e   :  { %1261 = vst.msk [vmem:[#allocation2 + $0x28] sm:$0xff] %vm192_vm2, %v2481_v6  ;;  %2254 = vmatmul.mubr.msk.f32.vlgmr.msra.gmra.mrb[20].mxu0 %vm192_vm2, %v2481_v6  ;;  %v1601_v6 = vmax.f32 %v1593_v4, 0.0 }
 0x55f   :  { %2423 = vmatpush3.bf16.msra.mxu0 %v2594_v20  ;;  %2275 = vmatprep.mubr.msk.f32.mxu0 %vm2493_vm1, %v2494_v35  ;;  %v1606_v20 = vld [vmem:[%s2866_s7] sm:$0xff] }
 0x560   :  { %2424 = vmatprep.subr.bf16.mxu0 %v2492_v19 }
 0x563   :  { %2426 = vmatpush3.bf16.msra.mxu0 %v2623_v30  ;;  %v1607_v30 = vld [vmem:[%s2866_s7 + $0x8] sm:$0xff] }
 0x564   :  { %v2483_v7 = vpop.eup %2482  ;;  %v2441_v8 = vpack.c.bf16 %v1607_v30, %v1606_v20  ;;  %v1595_v20 = vld [vmem:[#allocation3 + $0x28] sm:$0xff]  ;;  %v1596_v30 = vld [vmem:[#allocation3 + $0x30] sm:$0xff] }
 0x565   :  { %1262 = vst.msk [vmem:[#allocation3 + $0x10] sm:$0xff] %vm192_vm2, %v2483_v7  ;;  %2265 = vmatmul.mubr.msk.f32.vlgmr.msra.gmra.mrb[20].mxu1 %vm192_vm2, %v2483_v7  ;;  %v1579_v33 = vld [vmem:[#allocation2 + $0x28] sm:$0xff]  ;;  %v1602_v7 = vmax.f32 %v1594_v5, 0.0 }
 0x566   :  { %2429 = vmatpush3.bf16.msra.mxu1 %v2587_v17  ;;  %2286 = vmatprep.mubr.msk.f32.mxu1 %vm2493_vm1, %v2494_v35  ;;  %v1341_v35 = vld [vmem:[#allocation3 + $0x8] sm:$0xff]  ;;  %v1587_v36 = vmax.f32 %v1579_v33, 0.0 }
 0x567   :  { %2430 = vmatprep.subr.bf16.mxu1 %v2492_v19  ;;  %2442 = vmatprep.subr.bf16.mxu0 %v2441_v8 }
 0x56a   :  { %2432 = vmatpush3.bf16.msra.mxu1 %v2620_v29  ;;  %v1608_v29 = vld [vmem:[%s2866_s7 + $0x10] sm:$0xff] }
 0x56b   :  { %v2445_v16 = vpack.c.bf16 %v1609_v14, %v1608_v29  ;;  %2434 = vmatprep.subr.bf16.mxu1 %v2433_v40 }
 0x56c   :  { %v1592_v0 = vld [vmem:[#allocation3 + $0x10] sm:$0xff] }
 0x56d   :  { %v1600_v3 = vmax.f32 %v1592_v0, 0.0 }
 0x631   :  { %v1334_v10 = vpop.f32.mrb[20].mxu0 }
 0x632   :  { %v1338_v17 = vadd.f32 %v1334_v10, %v1264_v9  ;;  %v2255_v11 = vpop.f32.mrb[21].mxu0  ;;  %v1604_v9 = vmax.f32 %v1596_v30, 0.0  ;;  %v1597_v10 = vld [vmem:[#allocation3 + $0x38] sm:$0xff] }
 0x633   :  { %v15_v11 = vstv %s2868_s9 }
 0x634   :  { %2484 = vtanh.f32 %v1338_v17  ;;  %v1605_v17 = vmax.f32 %v1597_v10, 0.0  ;;  %16 = vst [vmem:[#allocation4] sm:$0x1] %v15_v11 }
 0x638   :  { %v1411_v12 = vpop.f32.mrb[20].mxu1 }
 0x639   :  { %v1415_v19 = vadd.f32 %v1411_v12, %v1341_v35  ;;  %v2266_v13 = vpop.f32.mrb[21].mxu1 }
 0x63b   :  { %2486 = vtanh.f32 %v1415_v19  ;;  %v1956_v13 = vld [vmem:[#allocation4] ss:$0 sm:$0xff] }
 0x63e   :  { %v2485_v18 = vpop.eup %2484 }
 0x63f   :  { %1417 = vst.msk [vmem:[#allocation2 + $0x30] sm:$0xff] %vm192_vm2, %v2485_v18  ;;  %2276 = vmatmul.mubr.msk.f32.vlgmr.msra.gmra.mrb[22].mxu0 %vm192_vm2, %v2485_v18 }
 0x640   :  { %2444 = vmatpush3.bf16.msra.mxu0 %v2441_v8  ;;  %2317 = vmatprep.mubr.msk.f32.mxu0 %vm192_vm2, %v1582_v21  ;;  %v1603_v8 = vmax.f32 %v1595_v20, 0.0 }
 0x641   :  { %2446 = vmatprep.subr.bf16.mxu0 %v2445_v16 }
 0x644   :  { %2448 = vmatpush3.bf16.msra.mxu0 %v2445_v16 }
 0x645   :  { %v2487_v24 = vpop.eup %2486 }
 0x646   :  { %1418 = vst.msk [vmem:[#allocation3 + $0x8] sm:$0xff] %vm192_vm2, %v2487_v24  ;;  %2287 = vmatmul.mubr.msk.f32.vlgmr.msra.gmra.mrb[22].mxu1 %vm192_vm2, %v2487_v24  ;;  %v1580_v34 = vld [vmem:[#allocation2 + $0x30] sm:$0xff] }
 0x647   :  { %2318 = vmatmul.mubr.msk.f32.vlgmr.msra.gmra.mrb[24].mxu0 %vm192_vm2, %v1583_v25  ;;  %v1588_v37 = vmax.f32 %v1580_v34, 0.0  ;;  %2436 = vmatpush3.bf16.msra.mxu1 %v2433_v40 }
 0x648   :  { %2320 = vmatprep.mubr.msk.f32.mxu0 %vm192_vm2, %v1584_v26  ;;  %2438 = vmatprep.subr.bf16.mxu1 %v2437_v43 }
 0x64b   :  { %2321 = vmatmul.mubr.msk.f32.gmra.mrb[26].mxu0 %vm192_vm2, %v1585_v31  ;;  %2440 = vmatpush3.bf16.msra.mxu1 %v2437_v43 }
 0x64c   :  { %2323 = vmatprep.mubr.msk.f32.mxu0 %vm192_vm2, %v1586_v32 }
 0x64d   :  { %v1591_v62 = vld [vmem:[#allocation3 + $0x8] sm:$0xff] }
 0x64e   :  { %v1599_v2 = vmax.f32 %v1591_v62, 0.0 }
 0x64f   :  { %2324 = vmatmul.mubr.msk.f32.gmra.mrb[28].mxu0 %vm192_vm2, %v1587_v36 }
 0x650   :  { %2326 = vmatprep.mubr.msk.f32.mxu0 %vm192_vm2, %v1588_v37 }
 0x712   :  { %v1490_v45 = vpop.f32.mrb[22].mxu0 }
 0x713   :  { %v1494_v46 = vadd.f32 %v1490_v45, %v1420_v44  ;;  %v2277_v47 = vpop.f32.mrb[23].mxu0 }
 0x715   :  { %2488 = vtanh.f32 %v1494_v46 }
 0x719   :  { %v1566_v49 = vpop.f32.mrb[22].mxu1 }
 0x71a   :  { %v1570_v50 = vadd.f32 %v1566_v49, %v1496_v48  ;;  %v2288_v51 = vpop.f32.mrb[23].mxu1  ;;  %v2319_v52 = vpop.f32.mrb[24].mxu0 }
 0x71b   :  { %v1833_v53 = vpop.f32.mrb[25].mxu0 }
 0x71c   :  { %2490 = vtanh.f32 %v1570_v50 }
 0x71e   :  { %v2322_v54 = vpop.f32.mrb[26].mxu0 }
 0x71f   :  { %v2489_v55 = vpop.eup %2488  ;;  %v1843_v56 = vpop.f32.mrb[27].mxu0 }
 0x720   :  { %1572 = vst.msk [vmem:[#allocation2 + $0x38] sm:$0xff] %vm192_vm2, %v2489_v55 }
 0x722   :  { %v2325_v57 = vpop.f32.mrb[28].mxu0 }
 0x723   :  { %v1853_v58 = vpop.f32.mrb[29].mxu0 }
 0x726   :  { %v2491_v59 = vpop.eup %2490 }
 0x727   :  { %1573 = vst.msk [vmem:[#allocation3] sm:$0xff] %vm192_vm2, %v2491_v59  ;;  %v1581_v60 = vld [vmem:[#allocation2 + $0x38] sm:$0xff] }
 0x728   :  { %v1589_v61 = vmax.f32 %v1581_v60, 0.0 }
 0x72a   :  { %2327 = vmatmul.mubr.msk.f32.gmra.mrb[30].mxu0 %vm192_vm2, %v1589_v61 }
 0x72e   :  { %v1590_v63 = vld [vmem:[#allocation3] sm:$0xff] }
 0x72f   :  { %v1598_v1 = vmax.f32 %v1590_v63, 0.0 }
 0x731   :  { %2297 = vmatprep.mubr.msk.f32.mxu1 %vm192_vm2, %v1598_v1 }
 0x732   :  { %2298 = vmatmul.mubr.msk.f32.vlgmr.msra.gmra.mrb[24].mxu1 %vm192_vm2, %v1599_v2 }
 0x733   :  { %2300 = vmatprep.mubr.msk.f32.mxu1 %vm192_vm2, %v1600_v3 }
 0x736   :  { %2301 = vmatmul.mubr.msk.f32.gmra.mrb[26].mxu1 %vm192_vm2, %v1601_v6 }
 0x737   :  { %2303 = vmatprep.mubr.msk.f32.mxu1 %vm192_vm2, %v1602_v7 }
 0x73a   :  { %2304 = vmatmul.mubr.msk.f32.gmra.mrb[28].mxu1 %vm192_vm2, %v1603_v8 }
 0x73b   :  { %2306 = vmatprep.mubr.msk.f32.mxu1 %vm192_vm2, %v1604_v9 }
 0x73e   :  { %2307 = vmatmul.mubr.msk.f32.gmra.mrb[30].mxu1 %vm192_vm2, %v1605_v17 }
 0x7fd   :  { %v2328_v35 = vpop.f32.mrb[30].mxu0 }
 0x7fe   :  { %v1863_v12 = vpop.f32.mrb[31].mxu0 }
 0x805   :  { %v2299_v19 = vpop.f32.mrb[24].mxu1 }
 0x806   :  { %v1839_v29 = vadd.f32 %v2319_v52, %v2299_v19  ;;  %v1704_v14 = vpop.f32.mrb[25].mxu1 }
 0x807   :  { %v1834_v15 = vadd.f32 %v1833_v53, %v1704_v14 }
 0x808   :  { %v1880_v16 = vadd.f32 %v1956_v13, %v1839_v29 }
 0x809   :  { %v1879_v18 = vadd.f32 %v1956_v13, %v1834_v15  ;;  %v2302_v21 = vpop.f32.mrb[26].mxu1 }
 0x80a   :  { %v1888_v22 = vmax.f32 %v1880_v16, 0.0  ;;  %v1849_v23 = vadd.f32 %v2322_v54, %v2302_v21  ;;  %v1714_v24 = vpop.f32.mrb[27].mxu1 }
 0x80b   :  { %v1887_v25 = vmax.f32 %v1879_v18, 0.0  ;;  %v1844_v26 = vadd.f32 %v1843_v56, %v1714_v24 }
 0x80c   :  { %1897 = vst.msk [vmem:[%s2869_s10 + $0x8] sm:$0xff] %vm1895_vm3, %v1888_v22  ;;  %v1882_v27 = vadd.f32 %v1956_v13, %v1849_v23 }
 0x80d   :  { %1896 = vst.msk [vmem:[%s2869_s10] sm:$0xff] %vm1895_vm3, %v1887_v25  ;;  %v1881_v28 = vadd.f32 %v1956_v13, %v1844_v26  ;;  %v2305_v31 = vpop.f32.mrb[28].mxu1 }
 0x80e   :  { %v1890_v32 = vmax.f32 %v1882_v27, 0.0  ;;  %v1859_v33 = vadd.f32 %v2325_v57, %v2305_v31  ;;  %v1724_v34 = vpop.f32.mrb[29].mxu1 }
 0x80f   :  { %v1889_v36 = vmax.f32 %v1881_v28, 0.0  ;;  %v1854_v37 = vadd.f32 %v1853_v58, %v1724_v34 }
 0x810   :  { %1899 = vst.msk [vmem:[%s2869_s10 + $0x18] sm:$0xff] %vm1895_vm3, %v1890_v32  ;;  %v1884_v38 = vadd.f32 %v1956_v13, %v1859_v33 }
 0x811   :  { %1898 = vst.msk [vmem:[%s2869_s10 + $0x10] sm:$0xff] %vm1895_vm3, %v1889_v36  ;;  %v1883_v39 = vadd.f32 %v1956_v13, %v1854_v37  ;;  %v2308_v40 = vpop.f32.mrb[30].mxu1 }
 0x812   :  { %v1892_v41 = vmax.f32 %v1884_v38, 0.0  ;;  %v1869_v42 = vadd.f32 %v2328_v35, %v2308_v40  ;;  %v1734_v43 = vpop.f32.mrb[31].mxu1 }
 0x813   :  { %v1891_v44 = vmax.f32 %v1883_v39, 0.0  ;;  %v1864_v45 = vadd.f32 %v1863_v12, %v1734_v43 }
 0x814   :  { %1901 = vst.msk [vmem:[%s2869_s10 + $0x28] sm:$0xff] %vm1895_vm3, %v1892_v41  ;;  %v1886_v46 = vadd.f32 %v1956_v13, %v1869_v42 }
 0x815   :  { %1900 = vst.msk [vmem:[%s2869_s10 + $0x20] sm:$0xff] %vm1895_vm3, %v1891_v44  ;;  %v1885_v47 = vadd.f32 %v1956_v13, %v1864_v45 }
 0x816   :  { %v1894_v48 = vmax.f32 %v1886_v46, 0.0 }
 0x817   :  { %v1893_v49 = vmax.f32 %v1885_v47, 0.0 }
 0x818   :  { %1903 = vst.msk [vmem:[%s2869_s10 + $0x38] sm:$0xff] %vm1895_vm3, %v1894_v48 }
 0x819   :  { %1902 = vst.msk [vmem:[%s2869_s10 + $0x30] sm:$0xff] %vm1895_vm3, %v1893_v49 }

</bundles_post_ra>
